<compile_context>
chip_gen: v7x
topology: tpu7x:2x2x1
jax: 0.10.0
libtpu: 0.0.40
codegen_flags: <defaults>
</compile_context>

<pallas_src>
import jax
import jax.numpy as jnp
from jax.experimental import pallas as pl
from jax.experimental.pallas import tpu as pltpu


def _decoder_kernel(x_ref, w_ref, b_ref, o_ref):
    # x_ref: (Bt, C*H)  bf16 activations (contiguous reshape of (Bt, C, H))
    # w_ref: (C*H, F*C) bf16 block-diagonal weight with the output permute folded in:
    #                   w[c*H+h, f*C+d] = W[c,h,f] * delta(c,d)
    # b_ref: (1, F*C)   f32 bias, bias2[0, f*C+c] = bias[c,f]
    # o_ref: (Bt, F*C)  f32 lane-dense output; out[b, f*C+c] == permuted[b, f, c]
    y = jnp.dot(x_ref[...], w_ref[...], preferred_element_type=jnp.float32)
    o_ref[...] = (y + b_ref[...]).astype(o_ref.dtype)


def prepare_decoder_params(weight, bias):
    """One-time (outside the hot path) packing.

    weight: (C, H, F), bias: (C, F)
      -> w_bd:  (C*H, F*C) bf16, block-diagonal, output layout = feature-major/channel-minor
         bias2: (1, F*C)   f32
    """
    C, H, F = weight.shape
    eye = jnp.eye(C, dtype=jnp.float32)
    # w4[c, h, f, d] = W[c, h, f] * delta(c, d)  -> rows c*H+h, cols f*C+d
    w4 = weight.astype(jnp.float32)[:, :, :, None] * eye[:, None, None, :]
    w_bd = w4.reshape(C * H, F * C).astype(jnp.bfloat16)
    bias2 = bias.astype(jnp.float32).T.reshape(1, F * C)
    return w_bd, bias2


def decoder_forward(encoded, w_bd, bias2):
    """encoded: (B, C, H) -> (B, F, C) (== fc1(dropout(x)).permute(0, 2, 1))."""
    B, C, H = encoded.shape
    FC = w_bd.shape[1]
    F = FC // C
    CH = C * H

    # Dropout(p=0.2) is identity in eval mode; contiguous reshape + bf16 feed to MXU.
    x2d = encoded.reshape(B, CH).astype(jnp.bfloat16)

    # Batch tile: full batch when small, otherwise MXU-row-sized tiles.
    block_b = B if B <= 256 else 256
    grid = (pl.cdiv(B, block_b),)

    cost = pl.CostEstimate(
        flops=2 * B * C * H * F,                 # useful MACs only
        transcendentals=0,
        bytes_accessed=x2d.size * 2 + w_bd.size * 2 + bias2.size * 4 + B * FC * 4,
    )

    out2d = pl.pallas_call(
        _decoder_kernel,
        out_shape=jax.ShapeDtypeStruct((B, FC), encoded.dtype),
        grid_spec=pltpu.PrefetchScalarGridSpec(
            num_scalar_prefetch=0,
            grid=grid,
            in_specs=[
                pl.BlockSpec((block_b, CH), lambda i: (i, 0)),
                pl.BlockSpec((CH, FC), lambda i: (0, 0)),   # weight pinned in VMEM
                pl.BlockSpec((1, FC), lambda i: (0, 0)),    # bias pinned in VMEM
            ],
            out_specs=pl.BlockSpec((block_b, FC), lambda i: (i, 0)),
        ),
        compiler_params=pltpu.CompilerParams(dimension_semantics=("parallel",)),
        cost_estimate=cost,
    )(x2d, w_bd, bias2)

    # Free contiguous view: out2d[b, f*C + c] -> (B, F, C), i.e. the permute(0,2,1).
    return out2d.reshape(B, F, C)


def reference_forward(encoded, weight, bias):
    y = jnp.einsum("bch,chf->bcf", encoded, weight,
                   precision=jax.lax.Precision.HIGHEST) + bias[None, :, :]
    return jnp.transpose(y, (0, 2, 1))


if __name__ == "__main__":
    B, C, H, F = 2, 7, 32, 16   # batch, n_channels (fixed=7), n_hidden, n_features

    key = jax.random.PRNGKey(0)
    k_x, k_w, k_b = jax.random.split(key, 3)

    encoded = jax.random.normal(k_x, (B, C, H), dtype=jnp.float32)
    # PyTorch-Linear-like uniform(-1/sqrt(H), 1/sqrt(H)) init.
    bound = 1.0 / (H ** 0.5)
    weight = jax.random.uniform(k_w, (C, H, F), jnp.float32, -bound, bound)
    bias = jax.random.uniform(k_b, (C, F), jnp.float32, -bound, bound)

    # One-time parameter packing (outside the jitted hot path).
    w_bd, bias2 = jax.block_until_ready(prepare_decoder_params(weight, bias))

    out = jax.jit(decoder_forward)(encoded, w_bd, bias2)
    out = jax.block_until_ready(out)
    assert out.shape == (B, F, C), out.shape

    # Tight check against a bf16-quantized-input reference (kernel feeds the MXU bf16).
    enc_q = encoded.astype(jnp.bfloat16).astype(jnp.float32)
    w_q = weight.astype(jnp.bfloat16).astype(jnp.float32)
    ref_q = reference_forward(enc_q, w_q, bias)
    assert jnp.allclose(out, ref_q, atol=1e-4, rtol=1e-4), float(
        jnp.max(jnp.abs(out - ref_q)))

    # Loose sanity check against the full-precision f32 reference.
    ref = reference_forward(encoded, weight, bias)
    assert jnp.allclose(out, ref, atol=5e-2, rtol=5e-2), float(
        jnp.max(jnp.abs(out - ref)))

    print("KERNEL_OK")
</pallas_src>

<mosaic_0001>
module attributes {stable_mosaic.version = 11 : i64} {
  func.func @_decoder_kernel(%arg0: i32, %arg1: memref<2x224xbf16, #tpu.memory_space<vmem>>, %arg2: memref<224x112xbf16, #tpu.memory_space<vmem>>, %arg3: memref<1x112xf32, #tpu.memory_space<vmem>>, %arg4: memref<2x112xf32, #tpu.memory_space<vmem>>) attributes {dimension_semantics = [#tpu.dimension_semantics<parallel>], iteration_bounds = array<i64: 1>, scalar_prefetch = 0 : i64, scratch_operands = 0 : i64, tpu.core_type = #tpu.core_type<tc>, window_params = [{transform_indices = @transform_0, window_bounds = array<i64: 2, 224>}, {pipeline_mode = #tpu.pipeline_mode<synchronous>, transform_indices = @transform_1, window_bounds = array<i64: 224, 112>}, {pipeline_mode = #tpu.pipeline_mode<synchronous>, transform_indices = @transform_2, window_bounds = array<i64: 1, 112>}, {transform_indices = @transform_3, window_bounds = array<i64: 2, 112>}]} {
    %c0 = arith.constant 0 : index
    %c0_0 = arith.constant 0 : index
    %0 = vector.load %arg1[%c0, %c0_0] : memref<2x224xbf16, #tpu.memory_space<vmem>>, vector<2x224xbf16>
    %c0_1 = arith.constant 0 : index
    %c0_2 = arith.constant 0 : index
    %1 = vector.load %arg2[%c0_1, %c0_2] : memref<224x112xbf16, #tpu.memory_space<vmem>>, vector<224x112xbf16>
    %cst = arith.constant dense<0.000000e+00> : vector<2x112xf32>
    %2 = tpu.matmul %0, %1, %cst {dimension_numbers = #tpu.dot_dimension_numbers<[1], [0], [0], [1], [0, 0, 1, 1], [], []>} : vector<2x224xbf16>, vector<224x112xbf16>, vector<2x112xf32> -> vector<2x112xf32>
    %c0_3 = arith.constant 0 : index
    %c0_4 = arith.constant 0 : index
    %3 = vector.load %arg3[%c0_3, %c0_4] : memref<1x112xf32, #tpu.memory_space<vmem>>, vector<1x112xf32>
    %4 = vector.broadcast %3 : vector<1x112xf32> to vector<2x112xf32>
    %5 = arith.addf %2, %4 : vector<2x112xf32>
    %c0_5 = arith.constant 0 : index
    %c0_6 = arith.constant 0 : index
    %6 = vector.load %arg4[%c0_5, %c0_6] : memref<2x112xf32, #tpu.memory_space<vmem>>, vector<2x112xf32>
    tpu.vector_store %arg4[%c0_5, %c0_6], %5 {strides = array<i32>} : memref<2x112xf32, #tpu.memory_space<vmem>>, vector<2x112xf32>,
    return
  }
  func.func @transform_0(%arg0: i32) -> (i32, i32) {
    %c0_i32 = arith.constant 0 : i32
    %c0_i32_0 = arith.constant 0 : i32
    return %arg0, %c0_i32 : i32, i32
  }
  func.func @transform_1(%arg0: i32) -> (i32, i32) {
    %c0_i32 = arith.constant 0 : i32
    %c0_i32_0 = arith.constant 0 : i32
    %c0_i32_1 = arith.constant 0 : i32
    return %c0_i32, %c0_i32_0 : i32, i32
  }
  func.func @transform_2(%arg0: i32) -> (i32, i32) {
    %c0_i32 = arith.constant 0 : i32
    %c0_i32_0 = arith.constant 0 : i32
    %c0_i32_1 = arith.constant 0 : i32
    return %c0_i32, %c0_i32_0 : i32, i32
  }
  func.func @transform_3(%arg0: i32) -> (i32, i32) {
    %c0_i32 = arith.constant 0 : i32
    %c0_i32_0 = arith.constant 0 : i32
    return %arg0, %c0_i32 : i32, i32
  }
}

</mosaic_0001>

<bundles_post_ra>
// kernel: decoder_forward.1
= control target key start
LH: loop header
LB: loop body
LE: loop exit
PB: predicated region body
PF: predicated region fallthrough
CT: control target
= control target key end

     0   :  { %8 = vsyncpa [#allocation3], 0  ;;  %s284_s12 = smov [#allocation2]   ;;  %s330_s0 = inlined_call_operand.vmem [shape: bf16[2,224], index: 0, kind: input, shape index: {}]   ;;  %s331_s1 = inlined_call_operand.hbm [shape: bf16[224,112], index: 1, kind: input, shape index: {}]   ;;  %s332_s2 = inlined_call_operand.vmem [shape: f32[1,112], index: 2, kind: input, shape index: {}]   ;;  %s333_s3 = inlined_call_operand.vmem [shape: f32[2,112], index: 3, kind: output, shape index: {}]  }
   0x1   :  { %s16_s13 = sshll.u32 %s284_s12, 4  ;;  %s260_s16 = scalar_lea.hbm %s331_s1, 1792  ;;  %s17_s13 = int_to_ptr.vmem [resolvable:$true] %s16_s13 }
   0x2   :  { %p261_p0 = scmp.ne.s32.totalorder %s331_s1, %s260_s16  ;;  %p264_p1 = scmp.lt.u32.totalorder %s260_s16, %s331_s1 }
   0x4   :  { %p266_p2 = pnand %p264_p1, %p261_p0 }
   0x6   :  { %269 = shalt.err (!%p266_p2)
}
   0x7   :  { %s270_s21 = scalar_lea.vmem %s17_s13, 1792  ;;  %p275_p4 = scmp.lt.s32.totalorder %s17_s13, %s17_s13 }
   0x8   :  { %p271_p3 = scmp.ne.s32.totalorder %s17_s13, %s270_s21  ;;  %p276_p5 = scmp.lt.s32.totalorder %s270_s21, %s270_s21 }
   0xa   :  { %p277_p6 = por %p276_p5, %p275_p4 }
   0xc   :  { %p278_p7 = pnand %p277_p6, %p271_p3 }
   0xe   :  { %281 = shalt.err (!%p278_p7)
}
   0xf   :  { %s285_s22 = smov 64   ;;  %s286_s23 = smov 4  }
  0x10   :  { %22 = dma.hbm_to_vmem [thread:$0]  %s331_s1, 1792, %s17_s13, [#allocation3], %s285_s22, %s285_s22, %s286_s23  }
  0x11   :  { %282 = dma.done.wait [#allocation3], 1792  }
  0x12   :  { %283 = vsyncadd [#allocation3], 4294965504  ;;  %v287_v0 = vmov 0   ;;  %v246_v1 = vld [vmem:[#allocation2] sm:$0xff]   ;;  %v247_v2 = vld [vmem:[#allocation2 + $0x8] sm:$0xff]   ;;  %v77_v5 = vlaneseq  ;;  %vm173_vm0 = vcmask 785408  }
  0x13   :  { %177 = vmatprep.subr.bf16.mxu0 %v287_v0  ;;  %v288_v3 = vmov 1966171168   ;;  %v248_v6 = vld [vmem:[#allocation2 + $0x10] sm:$0xff]   ;;  %v249_v9 = vld [vmem:[#allocation2 + $0x18] sm:$0xff]   ;;  %v250_v11 = vld [vmem:[#allocation2 + $0x20] sm:$0xff]   ;;  %vm217_vm1 = vcmask 910336  }
  0x14   :  { %178 = vmatpush1.bf16.msra.mxu0 %v246_v1  ;;  %v75_v4 = vunpack.c.l.s4 %v288_v3  ;;  %v78_v8 = vshrl.u32 %v77_v5, 7  ;;  %v225_v12 = vld.sshfl [vmem:[%s330_s0] sm:$0x11 pattern:$0x75316420]  ;;  %v251_v15 = vld [vmem:[#allocation2 + $0x28] sm:$0xff]  }
  0x15   :  { %179 = vmatprep.subr.bf16.mxu0 %v287_v0  ;;  %v73_v13 = vcombine.high %v225_v12, %v225_v12  ;;  %v252_v16 = vld [vmem:[#allocation2 + $0x30] sm:$0xff]   ;;  %v253_v17 = vld [vmem:[#allocation2 + $0x38] sm:$0xff]   ;;  %v254_v18 = vld [vmem:[#allocation2 + $0x40] sm:$0xff]  }
  0x16   :  { %v76_v7 = vunpack.c.0.s8 %v75_v4  ;;  %v255_v19 = vld [vmem:[#allocation2 + $0x48] sm:$0xff]   ;;  %v256_v20 = vld [vmem:[#allocation2 + $0x50] sm:$0xff]   ;;  %v257_v21 = vld [vmem:[#allocation2 + $0x58] sm:$0xff]  }
  0x17   :  { %v258_v22 = vld [vmem:[#allocation2 + $0x60] sm:$0xff]   ;;  %v259_v23 = vld [vmem:[#allocation2 + $0x68] sm:$0xff]  }
  0x18   :  { %180 = vmatpush1.bf16.msra.mxu0 %v247_v2  ;;  %v79_v10 = vsub.s32 %v76_v7, %v78_v8  ;;  %v224_v25 = vld [vmem:[%s332_s2] ss:$0 sm:$0xff] }
  0x19   :  { %181 = vmatprep.subr.bf16.mxu0 %v287_v0 }
  0x1a   :  { %v87_v14 = vrot.slane %v73_v13, %v79_v10  ;;  %v80_v24 = vrot.slane %v225_v12, %v79_v10 }
  0x1c   :  { %182 = vmatpush1.bf16.msra.mxu0 %v248_v6  ;;  %240 = vmatprep.mubr.msk.bf16.mxu0 %vm173_vm0, %v87_v14 }
  0x1d   :  { %183 = vmatprep.subr.bf16.mxu0 %v287_v0 }
  0x20   :  { %184 = vmatpush1.bf16.msra.mxu0 %v249_v9 }
  0x21   :  { %185 = vmatprep.subr.bf16.mxu0 %v287_v0 }
  0x24   :  { %186 = vmatpush1.bf16.msra.mxu0 %v250_v11 }
  0x25   :  { %187 = vmatprep.subr.bf16.mxu0 %v287_v0 }
  0x28   :  { %188 = vmatpush1.bf16.msra.mxu0 %v251_v15 }
  0x29   :  { %189 = vmatprep.subr.bf16.mxu0 %v287_v0 }
  0x2c   :  { %190 = vmatpush1.bf16.msra.mxu0 %v252_v16 }
  0x2d   :  { %191 = vmatprep.subr.bf16.mxu0 %v287_v0 }
  0x30   :  { %192 = vmatpush1.bf16.msra.mxu0 %v253_v17 }
  0x31   :  { %193 = vmatprep.subr.bf16.mxu0 %v287_v0 }
  0x34   :  { %194 = vmatpush1.bf16.msra.mxu0 %v254_v18 }
  0x35   :  { %195 = vmatprep.subr.bf16.mxu0 %v287_v0 }
  0x38   :  { %196 = vmatpush1.bf16.msra.mxu0 %v255_v19 }
  0x39   :  { %197 = vmatprep.subr.bf16.mxu0 %v287_v0 }
  0x3c   :  { %198 = vmatpush1.bf16.msra.mxu0 %v256_v20 }
  0x3d   :  { %199 = vmatprep.subr.bf16.mxu0 %v287_v0 }
  0x40   :  { %200 = vmatpush1.bf16.msra.mxu0 %v257_v21 }
  0x41   :  { %201 = vmatprep.subr.bf16.mxu0 %v287_v0 }
  0x44   :  { %202 = vmatpush1.bf16.msra.mxu0 %v258_v22 }
  0x45   :  { %203 = vmatprep.subr.bf16.mxu0 %v287_v0 }
  0x48   :  { %204 = vmatpush1.bf16.msra.mxu0 %v259_v23 }
  0x4b   :  { %210 = vmatmul.mubr.bf16.vlgmr.msra.gmra.mrb[0].mxu0 %v80_v24 }
 0x11e   :  { %v211_v26 = vpop.f32.mrb[0].mxu0 }
 0x11f   :  { %v212_v27 = vadd.f32 %v224_v25, %v211_v26  ;;  %v213_v28 = vpop.f32.mrb[1].mxu0 }
 0x120   :  { %v214_v29 = vpop.f32.mrb[2].mxu0 }
 0x121   :  { %218 = vst.msk [vmem:[%s333_s3] sm:$0x3] %vm217_vm1, %v212_v27  ;;  %v215_v30 = vpop.f32.mrb[3].mxu0 }
 0x122   :  { %223 = vsyncpa [#allocation3], 1 }

</bundles_post_ra>
